<compile_context>
chip_gen: v7x
topology: tpu7x:2x2x1
jax: 0.10.0
libtpu: 0.0.40
codegen_flags: <defaults>
</compile_context>

<pallas_src>
import math

import jax
import jax.numpy as jnp
from jax.experimental import pallas as pl

# ----------------------------- config ---------------------------------------
B = 2          # batch
S = 8          # sequence length
D = 32         # d_model
H = 4          # num_heads
DH = D // H    # head dim
DFF = 64       # d_ff
EPS = 1e-6


# ----------------------------- kernel ---------------------------------------
def _layernorm(y, gamma, beta):
    mu = jnp.mean(y, axis=-1, keepdims=True)
    var = jnp.mean((y - mu) ** 2, axis=-1, keepdims=True)
    return (y - mu) * jax.lax.rsqrt(var + EPS) * gamma + beta


def encoder_layer_kernel(x_ref, mask_ref, wqkv_ref, bqkv_ref, wo_ref,
                         w1_ref, b1_ref, w2_ref, vec_ref, o_ref):
    xf = x_ref[...]                      # (B*S, D)   batch folded into rows
    mask = mask_ref[...]                 # (B, S, S)
    nb, s, _ = mask.shape
    bs, d = xf.shape
    nh, dh, _ = wo_ref.shape             # (H, DH, D)

    vecs = vec_ref[...]                  # (6, D): [bo, b2, g1, be1, g2, be2]
    bo, b2 = vecs[0:1], vecs[1:2]
    g1, be1 = vecs[2:3], vecs[3:4]
    g2, be2 = vecs[4:5], vecs[5:6]

    # ---- fused QKV projection (Wq / bq pre-scaled by 1/sqrt(DH) host-side) ----
    qkv = jnp.dot(xf, wqkv_ref[...],
                  preferred_element_type=jnp.float32) + bqkv_ref[...]   # (B*S, 3D)
    qkv = qkv.reshape(bs, 3 * nh, dh).transpose(1, 0, 2)                # (3H, B*S, DH)
    q = qkv[0:nh]
    k = qkv[nh:2 * nh]
    v = qkv[2 * nh:3 * nh]

    # ---- additive mask bias, block-diagonal over the folded batch ----
    # 0 = attend, -1e9 = masked; off-diagonal batch blocks fully masked.
    mb = (mask - 1.0) * 1e9
    neg = jnp.full((s, s), -1e9, dtype=jnp.float32)
    bias = jnp.concatenate(
        [jnp.concatenate([mb[r] if c == r else neg for c in range(nb)], axis=1)
         for r in range(nb)], axis=0)                                   # (B*S, B*S)

    # ---- head-batched attention (one batch dim = heads) ----
    sc = jnp.einsum('hqd,hkd->hqk', q, k,
                    preferred_element_type=jnp.float32)                 # (H, B*S, B*S)
    sc = sc + bias[None]
    sc = sc - jnp.max(sc, axis=-1, keepdims=True)
    p = jnp.exp(sc)
    denom = jnp.sum(p, axis=-1, keepdims=True)
    inv = pl.reciprocal(denom, approx=True)      # EUP slot
    inv = inv * (2.0 - denom * inv)              # one Newton step -> ~f32 accuracy
    p = p * inv
    ctx = jnp.einsum('hqk,hkd->hqd', p, v,
                     preferred_element_type=jnp.float32)                # (H, B*S, DH)

    # ---- output projection folded into per-head accumulation (no concat) ----
    attn = jnp.sum(
        jnp.einsum('hqd,hdo->hqo', ctx, wo_ref[...],
                   preferred_element_type=jnp.float32),
        axis=0) + bo                                                    # (B*S, D)

    # residual + layer norm 1
    x1 = _layernorm(xf + attn, g1, be1)

    # ---- feed forward ----
    hdn = jnp.dot(x1, w1_ref[...], preferred_element_type=jnp.float32) + b1_ref[...]
    hdn = jnp.maximum(hdn, 0.0)
    ffn = jnp.dot(hdn, w2_ref[...], preferred_element_type=jnp.float32) + b2

    # residual + layer norm 2
    o_ref[...] = _layernorm(x1 + ffn, g2, be2)


# ----------------------------- host-side packing ------------------------------
def pack_params(p):
    """One-time host-side packing: fuse QKV weights, fold the attention scale,
    reshape Wo per head, and pack the small bias/gamma/beta vectors."""
    scale = 1.0 / math.sqrt(DH)
    wqkv = jnp.concatenate([p["wq"] * scale, p["wk"], p["wv"]], axis=1)   # (D, 3D)
    bqkv = jnp.concatenate([p["bq"] * scale, p["bk"], p["bv"]], axis=1)   # (1, 3D)
    wo_h = p["wo"].reshape(H, DH, D)                                      # (H, DH, D)
    vecs = jnp.concatenate([p["bo"], p["b2"], p["g1"], p["be1"],
                            p["g2"], p["be2"]], axis=0)                   # (6, D)
    return {"wqkv": wqkv, "bqkv": bqkv, "wo_h": wo_h,
            "w1": p["w1"], "b1": p["b1"], "w2": p["w2"], "vecs": vecs}


# ----------------------------- wrapper ---------------------------------------
def encoder_layer(x, mask, packed):
    """x: (B, S, D) f32, mask: (B, S, S) f32 (1 = attend, 0 = masked)."""
    b, s, d = x.shape
    xf = x.reshape(b * s, d)      # fold batch into rows (free for row-major)
    out = pl.pallas_call(
        encoder_layer_kernel,
        out_shape=jax.ShapeDtypeStruct((b * s, d), jnp.float32),
    )(xf, mask, packed["wqkv"], packed["bqkv"], packed["wo_h"],
      packed["w1"], packed["b1"], packed["w2"], packed["vecs"])
    return out.reshape(b, s, d)


def init_params(key):
    ks = jax.random.split(key, 8)
    std = 0.02
    return {
        "wq": jax.random.normal(ks[0], (D, D), jnp.float32) * std,
        "wk": jax.random.normal(ks[1], (D, D), jnp.float32) * std,
        "wv": jax.random.normal(ks[2], (D, D), jnp.float32) * std,
        "wo": jax.random.normal(ks[3], (D, D), jnp.float32) * std,
        "w1": jax.random.normal(ks[4], (D, DFF), jnp.float32) * std,
        "w2": jax.random.normal(ks[5], (DFF, D), jnp.float32) * std,
        "bq": jnp.zeros((1, D), jnp.float32),
        "bk": jnp.zeros((1, D), jnp.float32),
        "bv": jnp.zeros((1, D), jnp.float32),
        "bo": jnp.zeros((1, D), jnp.float32),
        "b1": jnp.zeros((1, DFF), jnp.float32),
        "b2": jnp.zeros((1, D), jnp.float32),
        "g1": jnp.ones((1, D), jnp.float32),
        "be1": jnp.zeros((1, D), jnp.float32),
        "g2": jnp.ones((1, D), jnp.float32),
        "be2": jnp.zeros((1, D), jnp.float32),
    }


# ----------------------------- reference (pure JAX) ---------------------------
def encoder_layer_ref(x, mask, p):
    def ln(y, g, b):
        mu = jnp.mean(y, axis=-1, keepdims=True)
        var = jnp.mean((y - mu) ** 2, axis=-1, keepdims=True)
        return (y - mu) * jax.lax.rsqrt(var + EPS) * g + b

    q = x @ p["wq"] + p["bq"]
    k = x @ p["wk"] + p["bk"]
    v = x @ p["wv"] + p["bv"]
    qh = q.reshape(B, S, H, DH).transpose(0, 2, 1, 3)
    kh = k.reshape(B, S, H, DH).transpose(0, 2, 1, 3)
    vh = v.reshape(B, S, H, DH).transpose(0, 2, 1, 3)
    sc = jnp.einsum('bhqd,bhkd->bhqk', qh, kh) / math.sqrt(DH)
    sc = jnp.where(mask[:, None, :, :] == 0, -1e9, sc)
    pmat = jax.nn.softmax(sc, axis=-1)
    attn = jnp.einsum('bhqk,bhkd->bhqd', pmat, vh).transpose(0, 2, 1, 3).reshape(B, S, D)
    attn = attn @ p["wo"] + p["bo"]
    x1 = ln(x + attn, p["g1"], p["be1"])
    ffn = jnp.maximum(x1 @ p["w1"] + p["b1"], 0.0) @ p["w2"] + p["b2"]
    return ln(x1 + ffn, p["g2"], p["be2"])


# ----------------------------- main -------------------------------------------
if __name__ == "__main__":
    key = jax.random.PRNGKey(0)
    k_x, k_p = jax.random.split(key)
    x = jax.random.normal(k_x, (B, S, D), jnp.float32)
    # causal-style mask just to exercise masking (1 = attend, 0 = masked)
    mask = jnp.tril(jnp.ones((S, S), jnp.float32))[None].repeat(B, axis=0)

    params = init_params(k_p)
    packed = pack_params(params)          # one-time host-side packing

    out = encoder_layer(x, mask, packed)
    out = jax.block_until_ready(out)

    ref = encoder_layer_ref(x, mask, params)
    assert out.shape == (B, S, D)
    assert jnp.all(jnp.isfinite(out))
    assert jnp.allclose(out, ref, atol=1e-4, rtol=1e-4)
    print("KERNEL_OK")
</pallas_src>

<mosaic_0001>
module attributes {stable_mosaic.version = 11 : i64} {
  func.func @encoder_layer_kernel(%arg0: memref<16x32xf32, #tpu.memory_space<vmem>>, %arg1: memref<2x8x8xf32, #tpu.memory_space<vmem>>, %arg2: memref<32x96xf32, #tpu.memory_space<vmem>>, %arg3: memref<1x96xf32, #tpu.memory_space<vmem>>, %arg4: memref<4x8x32xf32, #tpu.memory_space<vmem>>, %arg5: memref<32x64xf32, #tpu.memory_space<vmem>>, %arg6: memref<1x64xf32, #tpu.memory_space<vmem>>, %arg7: memref<64x32xf32, #tpu.memory_space<vmem>>, %arg8: memref<6x32xf32, #tpu.memory_space<vmem>>, %arg9: memref<16x32xf32, #tpu.memory_space<vmem>>) attributes {dimension_semantics = [], scalar_prefetch = 0 : i64, scratch_operands = 0 : i64, tpu.core_type = #tpu.core_type<tc>} {
    %c0 = arith.constant 0 : index
    %c0_0 = arith.constant 0 : index
    %0 = vector.load %arg0[%c0, %c0_0] : memref<16x32xf32, #tpu.memory_space<vmem>>, vector<16x32xf32>
    %c0_1 = arith.constant 0 : index
    %c0_2 = arith.constant 0 : index
    %c0_3 = arith.constant 0 : index
    %1 = vector.load %arg1[%c0_1, %c0_2, %c0_3] : memref<2x8x8xf32, #tpu.memory_space<vmem>>, vector<2x8x8xf32>
    %c0_4 = arith.constant 0 : index
    %c0_5 = arith.constant 0 : index
    %2 = vector.load %arg8[%c0_4, %c0_5] : memref<6x32xf32, #tpu.memory_space<vmem>>, vector<6x32xf32>
    %3 = vector.extract_strided_slice %2 {offsets = [0, 0], sizes = [1, 32], strides = [1, 1]} : vector<6x32xf32> to vector<1x32xf32>
    %4 = vector.extract_strided_slice %2 {offsets = [1, 0], sizes = [1, 32], strides = [1, 1]} : vector<6x32xf32> to vector<1x32xf32>
    %5 = vector.extract_strided_slice %2 {offsets = [2, 0], sizes = [1, 32], strides = [1, 1]} : vector<6x32xf32> to vector<1x32xf32>
    %6 = vector.extract_strided_slice %2 {offsets = [3, 0], sizes = [1, 32], strides = [1, 1]} : vector<6x32xf32> to vector<1x32xf32>
    %7 = vector.extract_strided_slice %2 {offsets = [4, 0], sizes = [1, 32], strides = [1, 1]} : vector<6x32xf32> to vector<1x32xf32>
    %8 = vector.extract_strided_slice %2 {offsets = [5, 0], sizes = [1, 32], strides = [1, 1]} : vector<6x32xf32> to vector<1x32xf32>
    %c0_6 = arith.constant 0 : index
    %c0_7 = arith.constant 0 : index
    %9 = vector.load %arg2[%c0_6, %c0_7] : memref<32x96xf32, #tpu.memory_space<vmem>>, vector<32x96xf32>
    %cst = arith.constant dense<0.000000e+00> : vector<16x96xf32>
    %10 = tpu.matmul %0, %9, %cst {dimension_numbers = #tpu.dot_dimension_numbers<[1], [0], [0], [1], [0, 0, 1, 1], [], []>} : vector<16x32xf32>, vector<32x96xf32>, vector<16x96xf32> -> vector<16x96xf32>
    %c0_8 = arith.constant 0 : index
    %c0_9 = arith.constant 0 : index
    %11 = vector.load %arg3[%c0_8, %c0_9] : memref<1x96xf32, #tpu.memory_space<vmem>>, vector<1x96xf32>
    %12 = vector.broadcast %11 : vector<1x96xf32> to vector<16x96xf32>
    %13 = arith.addf %10, %12 : vector<16x96xf32>
    %14 = vector.shape_cast %13 : vector<16x96xf32> to vector<16x12x8xf32>
    %15 = tpu.transpose %14, [1, 0, 2] : vector<16x12x8xf32> -> vector<12x16x8xf32>
    %16 = vector.extract_strided_slice %15 {offsets = [0, 0, 0], sizes = [4, 16, 8], strides = [1, 1, 1]} : vector<12x16x8xf32> to vector<4x16x8xf32>
    %17 = vector.extract_strided_slice %15 {offsets = [4, 0, 0], sizes = [4, 16, 8], strides = [1, 1, 1]} : vector<12x16x8xf32> to vector<4x16x8xf32>
    %18 = vector.extract_strided_slice %15 {offsets = [8, 0, 0], sizes = [4, 16, 8], strides = [1, 1, 1]} : vector<12x16x8xf32> to vector<4x16x8xf32>
    %cst_10 = arith.constant 1.000000e+00 : f32
    %19 = vector.broadcast %cst_10 : f32 to vector<2x8x8xf32>
    %20 = arith.subf %1, %19 : vector<2x8x8xf32>
    %cst_11 = arith.constant 1.000000e+09 : f32
    %21 = vector.broadcast %cst_11 : f32 to vector<2x8x8xf32>
    %22 = arith.mulf %20, %21 : vector<2x8x8xf32>
    %cst_12 = arith.constant -1.000000e+09 : f32
    %23 = vector.broadcast %cst_12 : f32 to vector<8x8xf32>
    %24 = vector.extract_strided_slice %22 {offsets = [0, 0, 0], sizes = [1, 8, 8], strides = [1, 1, 1]} : vector<2x8x8xf32> to vector<1x8x8xf32>
    %25 = vector.shape_cast %24 : vector<1x8x8xf32> to vector<8x8xf32>
    %26 = tpu.concatenate %25, %23 in 1 : vector<8x8xf32>, vector<8x8xf32> -> vector<8x16xf32>
    %27 = vector.extract_strided_slice %22 {offsets = [1, 0, 0], sizes = [1, 8, 8], strides = [1, 1, 1]} : vector<2x8x8xf32> to vector<1x8x8xf32>
    %28 = vector.shape_cast %27 : vector<1x8x8xf32> to vector<8x8xf32>
    %29 = tpu.concatenate %23, %28 in 1 : vector<8x8xf32>, vector<8x8xf32> -> vector<8x16xf32>
    %30 = tpu.concatenate %26, %29 in 0 : vector<8x16xf32>, vector<8x16xf32> -> vector<16x16xf32>
    "tpu.trace_start"() <{level = 10 : i32, message = "hqd,hkd->hqk"}> : () -> ()
    %cst_13 = arith.constant dense<0.000000e+00> : vector<4x16x16xf32>
    %31 = tpu.matmul %16, %17, %cst_13 {dimension_numbers = #tpu.dot_dimension_numbers<[2], [2], [1], [1], [0, 0, 0, 1, 1, 1], [0], [0]>} : vector<4x16x8xf32>, vector<4x16x8xf32>, vector<4x16x16xf32> -> vector<4x16x16xf32>
    "tpu.trace_stop"() : () -> ()
    %32 = vector.shape_cast %30 : vector<16x16xf32> to vector<1x16x16xf32>
    %33 = vector.broadcast %32 : vector<1x16x16xf32> to vector<4x16x16xf32>
    %34 = arith.addf %31, %33 : vector<4x16x16xf32>
    %cst_14 = arith.constant dense<0xFF800000> : vector<4x16xf32>
    %35 = vector.multi_reduction <maximumf>, %34, %cst_14 [2] : vector<4x16x16xf32> to vector<4x16xf32>
    %36 = vector.shape_cast %35 : vector<4x16xf32> to vector<4x16x1xf32>
    %37 = vector.broadcast %36 : vector<4x16x1xf32> to vector<4x16x16xf32>
    %38 = arith.subf %34, %37 : vector<4x16x16xf32>
    %39 = math.exp %38 : vector<4x16x16xf32>
    %cst_15 = arith.constant dense<0.000000e+00> : vector<4x16xf32>
    %40 = vector.multi_reduction <add>, %39, %cst_15 [2] : vector<4x16x16xf32> to vector<4x16xf32>
    %41 = vector.shape_cast %40 : vector<4x16xf32> to vector<4x16x1xf32>
    %42 = tpu.reciprocal %41 {approx = true} : vector<4x16x1xf32> -> vector<4x16x1xf32>
    %43 = arith.mulf %41, %42 : vector<4x16x1xf32>
    %cst_16 = arith.constant 2.000000e+00 : f32
    %44 = vector.broadcast %cst_16 : f32 to vector<4x16x1xf32>
    %45 = arith.subf %44, %43 : vector<4x16x1xf32>
    %46 = arith.mulf %42, %45 : vector<4x16x1xf32>
    %47 = vector.broadcast %46 : vector<4x16x1xf32> to vector<4x16x16xf32>
    %48 = arith.mulf %39, %47 : vector<4x16x16xf32>
    "tpu.trace_start"() <{level = 10 : i32, message = "hqk,hkd->hqd"}> : () -> ()
    %cst_17 = arith.constant dense<0.000000e+00> : vector<4x16x8xf32>
    %49 = tpu.matmul %48, %18, %cst_17 {dimension_numbers = #tpu.dot_dimension_numbers<[2], [1], [1], [2], [0, 0, 0, 1, 1, 2], [0], [0]>} : vector<4x16x16xf32>, vector<4x16x8xf32>, vector<4x16x8xf32> -> vector<4x16x8xf32>
    "tpu.trace_stop"() : () -> ()
    %c0_18 = arith.constant 0 : index
    %c0_19 = arith.constant 0 : index
    %c0_20 = arith.constant 0 : index
    %50 = vector.load %arg4[%c0_18, %c0_19, %c0_20] : memref<4x8x32xf32, #tpu.memory_space<vmem>>, vector<4x8x32xf32>
    "tpu.trace_start"() <{level = 10 : i32, message = "hqd,hdo->hqo"}> : () -> ()
    %cst_21 = arith.constant dense<0.000000e+00> : vector<4x16x32xf32>
    %51 = tpu.matmul %49, %50, %cst_21 {dimension_numbers = #tpu.dot_dimension_numbers<[2], [1], [1], [2], [0, 0, 0, 1, 1, 2], [0], [0]>} : vector<4x16x8xf32>, vector<4x8x32xf32>, vector<4x16x32xf32> -> vector<4x16x32xf32>
    "tpu.trace_stop"() : () -> ()
    %cst_22 = arith.constant dense<0.000000e+00> : vector<16x32xf32>
    %52 = vector.multi_reduction <add>, %51, %cst_22 [0] : vector<4x16x32xf32> to vector<16x32xf32>
    %53 = vector.broadcast %3 : vector<1x32xf32> to vector<16x32xf32>
    %54 = arith.addf %52, %53 : vector<16x32xf32>
    %55 = arith.addf %0, %54 : vector<16x32xf32>
    %cst_23 = arith.constant dense<0.000000e+00> : vector<16xf32>
    %56 = vector.multi_reduction <add>, %55, %cst_23 [1] : vector<16x32xf32> to vector<16xf32>
    %57 = vector.shape_cast %56 : vector<16xf32> to vector<16x1xf32>
    %cst_24 = arith.constant 3.200000e+01 : f32
    %58 = vector.broadcast %cst_24 : f32 to vector<16x1xf32>
    %59 = arith.divf %57, %58 : vector<16x1xf32>
    %60 = vector.broadcast %59 : vector<16x1xf32> to vector<16x32xf32>
    %61 = arith.subf %55, %60 : vector<16x32xf32>
    %62 = arith.mulf %61, %61 : vector<16x32xf32>
    %cst_25 = arith.constant dense<0.000000e+00> : vector<16xf32>
    %63 = vector.multi_reduction <add>, %62, %cst_25 [1] : vector<16x32xf32> to vector<16xf32>
    %64 = vector.shape_cast %63 : vector<16xf32> to vector<16x1xf32>
    %cst_26 = arith.constant 3.200000e+01 : f32
    %65 = vector.broadcast %cst_26 : f32 to vector<16x1xf32>
    %66 = arith.divf %64, %65 : vector<16x1xf32>
    %67 = vector.broadcast %59 : vector<16x1xf32> to vector<16x32xf32>
    %68 = arith.subf %55, %67 : vector<16x32xf32>
    %cst_27 = arith.constant 9.99999997E-7 : f32
    %69 = vector.broadcast %cst_27 : f32 to vector<16x1xf32>
    %70 = arith.addf %66, %69 : vector<16x1xf32>
    %71 = math.rsqrt %70 : vector<16x1xf32>
    %72 = vector.broadcast %71 : vector<16x1xf32> to vector<16x32xf32>
    %73 = arith.mulf %68, %72 : vector<16x32xf32>
    %74 = vector.broadcast %5 : vector<1x32xf32> to vector<16x32xf32>
    %75 = arith.mulf %73, %74 : vector<16x32xf32>
    %76 = vector.broadcast %6 : vector<1x32xf32> to vector<16x32xf32>
    %77 = arith.addf %75, %76 : vector<16x32xf32>
    %c0_28 = arith.constant 0 : index
    %c0_29 = arith.constant 0 : index
    %78 = vector.load %arg5[%c0_28, %c0_29] : memref<32x64xf32, #tpu.memory_space<vmem>>, vector<32x64xf32>
    %cst_30 = arith.constant dense<0.000000e+00> : vector<16x64xf32>
    %79 = tpu.matmul %77, %78, %cst_30 {dimension_numbers = #tpu.dot_dimension_numbers<[1], [0], [0], [1], [0, 0, 1, 1], [], []>} : vector<16x32xf32>, vector<32x64xf32>, vector<16x64xf32> -> vector<16x64xf32>
    %c0_31 = arith.constant 0 : index
    %c0_32 = arith.constant 0 : index
    %80 = vector.load %arg6[%c0_31, %c0_32] : memref<1x64xf32, #tpu.memory_space<vmem>>, vector<1x64xf32>
    %81 = vector.broadcast %80 : vector<1x64xf32> to vector<16x64xf32>
    %82 = arith.addf %79, %81 : vector<16x64xf32>
    %cst_33 = arith.constant 0.000000e+00 : f32
    %83 = vector.broadcast %cst_33 : f32 to vector<16x64xf32>
    %84 = arith.maximumf %82, %83 : vector<16x64xf32>
    %c0_34 = arith.constant 0 : index
    %c0_35 = arith.constant 0 : index
    %85 = vector.load %arg7[%c0_34, %c0_35] : memref<64x32xf32, #tpu.memory_space<vmem>>, vector<64x32xf32>
    %cst_36 = arith.constant dense<0.000000e+00> : vector<16x32xf32>
    %86 = tpu.matmul %84, %85, %cst_36 {dimension_numbers = #tpu.dot_dimension_numbers<[1], [0], [0], [1], [0, 0, 1, 1], [], []>} : vector<16x64xf32>, vector<64x32xf32>, vector<16x32xf32> -> vector<16x32xf32>
    %87 = vector.broadcast %4 : vector<1x32xf32> to vector<16x32xf32>
    %88 = arith.addf %86, %87 : vector<16x32xf32>
    %89 = arith.addf %77, %88 : vector<16x32xf32>
    %cst_37 = arith.constant dense<0.000000e+00> : vector<16xf32>
    %90 = vector.multi_reduction <add>, %89, %cst_37 [1] : vector<16x32xf32> to vector<16xf32>
    %91 = vector.shape_cast %90 : vector<16xf32> to vector<16x1xf32>
    %cst_38 = arith.constant 3.200000e+01 : f32
    %92 = vector.broadcast %cst_38 : f32 to vector<16x1xf32>
    %93 = arith.divf %91, %92 : vector<16x1xf32>
    %94 = vector.broadcast %93 : vector<16x1xf32> to vector<16x32xf32>
    %95 = arith.subf %89, %94 : vector<16x32xf32>
    %96 = arith.mulf %95, %95 : vector<16x32xf32>
    %cst_39 = arith.constant dense<0.000000e+00> : vector<16xf32>
    %97 = vector.multi_reduction <add>, %96, %cst_39 [1] : vector<16x32xf32> to vector<16xf32>
    %98 = vector.shape_cast %97 : vector<16xf32> to vector<16x1xf32>
    %cst_40 = arith.constant 3.200000e+01 : f32
    %99 = vector.broadcast %cst_40 : f32 to vector<16x1xf32>
    %100 = arith.divf %98, %99 : vector<16x1xf32>
    %101 = vector.broadcast %93 : vector<16x1xf32> to vector<16x32xf32>
    %102 = arith.subf %89, %101 : vector<16x32xf32>
    %cst_41 = arith.constant 9.99999997E-7 : f32
    %103 = vector.broadcast %cst_41 : f32 to vector<16x1xf32>
    %104 = arith.addf %100, %103 : vector<16x1xf32>
    %105 = math.rsqrt %104 : vector<16x1xf32>
    %106 = vector.broadcast %105 : vector<16x1xf32> to vector<16x32xf32>
    %107 = arith.mulf %102, %106 : vector<16x32xf32>
    %108 = vector.broadcast %7 : vector<1x32xf32> to vector<16x32xf32>
    %109 = arith.mulf %107, %108 : vector<16x32xf32>
    %110 = vector.broadcast %8 : vector<1x32xf32> to vector<16x32xf32>
    %111 = arith.addf %109, %110 : vector<16x32xf32>
    %c0_42 = arith.constant 0 : index
    %c0_43 = arith.constant 0 : index
    %112 = vector.load %arg9[%c0_42, %c0_43] : memref<16x32xf32, #tpu.memory_space<vmem>>, vector<16x32xf32>
    tpu.vector_store %arg9[%c0_42, %c0_43], %111 {strides = array<i32>} : memref<16x32xf32, #tpu.memory_space<vmem>>, vector<16x32xf32>,
    return
  }
}

</mosaic_0001>

<bundles_post_ra>
// kernel: tpu_custom_call.1
= control target key start
LH: loop header
LB: loop body
LE: loop exit
PB: predicated region body
PF: predicated region fallthrough
CT: control target
= control target key end

     0   :  { %14 = vsyncpa [#allocation3], 0  ;;  %s3410_s0 = inlined_call_operand.hbm [shape: f32[16,32], index: 0, kind: input, shape index: {}]   ;;  %s3411_s1 = inlined_call_operand.hbm [shape: f32[2,8,8], index: 1, kind: input, shape index: {}]   ;;  %s3412_s2 = inlined_call_operand.vmem [shape: f32[32,96], index: 2, kind: input, shape index: {}]   ;;  %s3413_s3 = inlined_call_operand.vmem [shape: f32[1,96], index: 3, kind: input, shape index: {}]   ;;  %s3414_s4 = inlined_call_operand.vmem [shape: f32[4,8,32], index: 4, kind: input, shape index: {}]   ;;  %s3415_s5 = inlined_call_operand.vmem [shape: f32[32,64], index: 5, kind: input, shape index: {}]   ;;  %s3416_s6 = inlined_call_operand.vmem [shape: f32[1,64], index: 6, kind: input, shape index: {}]   ;;  %s3417_s7 = inlined_call_operand.vmem [shape: f32[64,32], index: 7, kind: input, shape index: {}]   ;;  %s3418_s8 = inlined_call_operand.vmem [shape: f32[6,32], index: 8, kind: input, shape index: {}]   ;;  %s3419_s9 = inlined_call_operand.hbm [shape: f32[16,32], index: 9, kind: output, shape index: {}]  }
   0x1   :  { %15 = vsyncpa [#allocation6], 0 }
   0x2   :  { %16 = vsyncpa [#allocation4], 0  ;;  %s2925_s30 = smov [#allocation2]   ;;  %s2853_s13 = scalar_lea.hbm %s3410_s0, 256 }
   0x3   :  { %s22_s10 = sshll.u32 %s2925_s30, 4  ;;  %p2854_p0 = scmp.ne.s32.totalorder %s3410_s0, %s2853_s13  ;;  %s23_s10 = int_to_ptr.vmem [resolvable:$true] %s22_s10 }
   0x4   :  { %p2857_p1 = scmp.lt.u32.totalorder %s2853_s13, %s3410_s0 }
   0x6   :  { %p2859_p2 = pnand %p2857_p1, %p2854_p0 }
   0x8   :  { %2862 = shalt.err (!%p2859_p2)
}
   0x9   :  { %s2863_s18 = scalar_lea.vmem %s23_s10, 256  ;;  %p2868_p4 = scmp.lt.s32.totalorder %s23_s10, %s23_s10 }
   0xa   :  { %p2864_p3 = scmp.ne.s32.totalorder %s23_s10, %s2863_s18  ;;  %p2869_p5 = scmp.lt.s32.totalorder %s2863_s18, %s2863_s18 }
   0xc   :  { %p2870_p6 = por %p2869_p5, %p2868_p4 }
   0xe   :  { %p2871_p7 = pnand %p2870_p6, %p2864_p3 }
  0x10   :  { %2874 = shalt.err (!%p2871_p7)
}
  0x11   :  { %s2926_s19 = smov 128   ;;  %s2927_s20 = smov 8  }
  0x12   :  { %28 = dma.hbm_to_vmem [thread:$0]  %s3410_s0, 256, %s23_s10, [#allocation3], %s2926_s19, %s2926_s19, %s2927_s20  }
  0x13   :  { %s2928_s23 = smov [#allocation5]   ;;  %s2875_s27 = scalar_lea.hbm %s3411_s1, 256 }
  0x14   :  { %s34_s24 = sshll.u32 %s2928_s23, 4  ;;  %p2876_p8 = scmp.ne.s32.totalorder %s3411_s1, %s2875_s27  ;;  %s35_s24 = int_to_ptr.vmem [resolvable:$true] %s34_s24 }
  0x15   :  { %p2879_p9 = scmp.lt.u32.totalorder %s2875_s27, %s3411_s1 }
  0x17   :  { %p2881_p10 = pnand %p2879_p9, %p2876_p8 }
  0x19   :  { %2884 = shalt.err (!%p2881_p10)
}
  0x1a   :  { %s2885_s12 = scalar_lea.vmem %s35_s24, 256  ;;  %p2890_p12 = scmp.lt.s32.totalorder %s35_s24, %s35_s24 }
  0x1b   :  { %p2886_p11 = scmp.ne.s32.totalorder %s35_s24, %s2885_s12  ;;  %p2891_p13 = scmp.lt.s32.totalorder %s2885_s12, %s2885_s12 }
  0x1d   :  { %p2892_p0 = por %p2891_p13, %p2890_p12 }
  0x1f   :  { %p2893_p1 = pnand %p2892_p0, %p2886_p11 }
  0x21   :  { %2896 = shalt.err (!%p2893_p1)
}
  0x22   :  { %40 = dma.hbm_to_vmem [thread:$0]  %s3411_s1, 256, %s35_s24, [#allocation6], %s2926_s19, %s2926_s19, %s2927_s20  }
  0x23   :  { %2919 = dma.done.wait [#allocation3], 256  }
  0x24   :  { %2920 = vsyncadd [#allocation3], 4294967040 }
  0x25   :  { %2921 = dma.done.wait [#allocation6], 256  }
  0x26   :  { %2922 = vsyncadd [#allocation6], 4294967040  ;;  %vm77_vm0 = vcmask 261120   ;;  %v66_v0 = vld [vmem:[%s3412_s2] sm:$0xff]  ;;  %v67_v1 = vld [vmem:[%s3412_s2 + $0x8] sm:$0xff]  ;;  %s2930_s24 = smov 96   ;;  %v232_v18 = vlaneseq }
  0x27   :  { %v68_v2 = vld [vmem:[%s3412_s2 + $0x10] sm:$0xff]  ;;  %v2721_v3 = vpack.c.bf16 %v67_v1, %v66_v0  ;;  %v69_v4 = vld [vmem:[%s3412_s2 + $0x18] sm:$0xff]  ;;  %v61_v5 = vld [vmem:[#allocation2] sm:$0xff]  ;;  %s2929_s2 = smov 88   ;;  %s2931_s25 = smov 80   ;;  %vm1047_vm1 = vcmask 64512  }
  0x28   :  { %v2725_v6 = vpack.c.bf16 %v69_v4, %v68_v2  ;;  %2612 = vmatprep.mubr.msk.f32.mxu0 %vm77_vm0, %v61_v5  ;;  %v62_v7 = vld [vmem:[#allocation2 + $0x8] sm:$0xff]  ;;  %v2476_v8 = vld [vmem:[%s3413_s3] ss:$0 sm:$0xff]  ;;  %s2932_s26 = smov 72   ;;  %s2933_s3 = smov 120   ;;  %v64_v13 = vld [vmem:[#allocation5 + $0x8] sm:$0xff] }
  0x29   :  { %2722 = vmatprep.subr.bf16.mxu0 %v2721_v3  ;;  %s2934_s27 = smov 112   ;;  %s2935_s28 = smov 104   ;;  %v2500_v14 = vadd.f32 -1.0, %v64_v13  ;;  %v2938_v16 = vmov 1983009808   ;;  %v3063_v24 = vshrl.u32 %v232_v18, 7  ;;  %vm3129_vm2 = vmpackc.low %vm1047_vm1, %vm1047_vm1 }
  0x2a   :  { %2724 = vmatpush3.bf16.msra.mxu0 %v2721_v3  ;;  %s2936_s29 = smov 64   ;;  %s2937_s30 = smov 56   ;;  %v230_v17 = vunpack.c.l.s4 %v2938_v16  ;;  %v2939_v21 = vmov 1934713408   ;;  %vm1402_vm3 = vcmask 130048   ;;  %vm2334_vm4 = vcmask 523264  }
  0x2b   :  { %2726 = vmatprep.subr.bf16.mxu0 %v2725_v6  ;;  %v1046_v15 = vmul.f32 1e+09, %v2500_v14  ;;  %v294_v22 = vunpack.c.l.s4 %v2939_v21  ;;  %s2940_s11 = smov 48   ;;  %s2941_s12 = smov 40  }
  0x2c   :  { %v231_v23 = vunpack.c.0.s8 %v230_v17 }
  0x2d   :  { %v295_v27 = vunpack.c.0.s8 %v294_v22 }
  0x2e   :  { %2728 = vmatpush3.bf16.msra.mxu0 %v2725_v6  ;;  %v3066_v28 = vsub.s32 %v231_v23, %v3063_v24 }
  0x2f   :  { %v3069_v35 = vsub.s32 %v295_v27, %v3063_v24 }
  0x31   :  { %2613 = vmatmul.mubr.msk.f32.vlgmr.msra.gmra.mrb[0].mxu0 %vm77_vm0, %v62_v7 }
 0x104   :  { %v2614_v9 = vpop.f32.mrb[0].mxu0 }
 0x105   :  { %v3040_v10 = vadd.f32 %v2614_v9, %v2476_v8  ;;  %v150_v11 = vpop.f32.mrb[1].mxu0 }
 0x106   :  { %v3044_v12 = vadd.f32 %v2476_v8, %v150_v11 }
 0x107   :  { %187 = vrot.lane.b32.xlu1 %v3040_v10, %s2929_s2  ;;  %181 = vrot.lane.b32.xlu0 %v3040_v10, %s2930_s24 }
 0x10b   :  { %193 = vrot.lane.b32.xlu1 %v3040_v10, %s2931_s25  ;;  %179 = vrot.lane.b32.xlu0 %v3044_v12, %s2930_s24 }
 0x10f   :  { %199 = vrot.lane.b32.xlu1 %v3040_v10, %s2932_s26  ;;  %191 = vrot.lane.b32.xlu0 %v3044_v12, %s2931_s25 }
 0x113   :  { %185 = vrot.lane.b32.xlu1 %v3044_v12, %s2929_s2  ;;  %197 = vrot.lane.b32.xlu0 %v3044_v12, %s2932_s26 }
 0x117   :  { %163 = vrot.lane.b32.xlu1 %v3040_v10, %s2933_s3  ;;  %161 = vrot.lane.b32.xlu0 %v3044_v12, %s2933_s3 }
 0x11b   :  { %167 = vrot.lane.b32.xlu1 %v3044_v12, %s2934_s27  ;;  %173 = vrot.lane.b32.xlu0 %v3044_v12, %s2935_s28 }
 0x11f   :  { %175 = vrot.lane.b32.xlu1 %v3040_v10, %s2935_s28  ;;  %169 = vrot.lane.b32.xlu0 %v3040_v10, %s2934_s27 }
 0x123   :  { %205 = vrot.lane.b32.xlu1 %v3040_v10, %s2936_s29  ;;  %1050 = vrot.lane.b32.xlu0 %v1046_v15, %s2927_s20 }
 0x127   :  { %209 = vrot.lane.b32.xlu1 %v3044_v12, %s2937_s30  ;;  %211 = vrot.lane.b32.xlu0 %v3040_v10, %s2937_s30 }
 0x12b   :  { %203 = vrot.lane.b32.xlu0 %v3044_v12, %s2936_s29 }
 0x179   :  { %v188_v19 = vpop.permute.xlu1 %187  ;;  %v182_v20 = vpop.permute.xlu0 %181 }
 0x17d   :  { %v194_v25 = vpop.permute.xlu1 %193  ;;  %v180_v26 = vpop.permute.xlu0 %179 }
 0x17e   :  { %v463_v29 = vcombine.low %v182_v20, %v194_v25  ;;  %v464_v30 = vcombine.high %v182_v20, %v194_v25 }
 0x180   :  { %v471_v36 = vrot.slane %v463_v29, %v3066_v28  ;;  %v478_v37 = vrot.slane %v464_v30, %v3066_v28 }
 0x181   :  { %v200_v31 = vpop.permute.xlu1 %199  ;;  %v192_v32 = vpop.permute.xlu0 %191 }
 0x182   :  { %v479_v33 = vcombine.low %v188_v19, %v200_v31  ;;  %v480_v34 = vcombine.high %v188_v19, %v200_v31  ;;  %v259_v40 = vcombine.low %v180_v26, %v192_v32  ;;  %v260_v41 = vcombine.high %v180_v26, %v192_v32 }
 0x184   :  { %v487_v38 = vrot.slane %v479_v33, %v3066_v28  ;;  %v494_v39 = vrot.slane %v480_v34, %v3066_v28  ;;  %v267_v54 = vrot.slane %v259_v40, %v3066_v28  ;;  %v274_v55 = vrot.slane %v260_v41, %v3066_v28 }
 0x185   :  { %v186_v42 = vpop.permute.xlu1 %185  ;;  %v198_v43 = vpop.permute.xlu0 %197 }
 0x186   :  { %v527_v44 = vcombine.low %v471_v36, %v487_v38  ;;  %v528_v45 = vcombine.high %v471_v36, %v487_v38  ;;  %v543_v46 = vcombine.low %v478_v37, %v494_v39  ;;  %v544_v47 = vcombine.high %v478_v37, %v494_v39 }
 0x187   :  { %v275_v48 = vcombine.low %v186_v42, %v198_v43  ;;  %v276_v49 = vcombine.high %v186_v42, %v198_v43 }
 0x188   :  { %v535_v50 = vrot.slane %v527_v44, %v3069_v35  ;;  %v542_v51 = vrot.slane %v528_v45, %v3069_v35  ;;  %v551_v52 = vrot.slane %v543_v46, %v3069_v35  ;;  %v558_v53 = vrot.slane %v544_v47, %v3069_v35 }
 0x189   :  { %v283_v56 = vrot.slane %v275_v48, %v3066_v28  ;;  %v290_v57 = vrot.slane %v276_v49, %v3066_v28  ;;  %v164_v58 = vpop.permute.xlu1 %163  ;;  %v162_v59 = vpop.permute.xlu0 %161 }
 0x18a   :  { %v2488_v0 = vcombine.low %v535_v50, %v542_v51  ;;  %v2490_v1 = vcombine.high %v535_v50, %v542_v51  ;;  %v2492_v2 = vcombine.low %v551_v52, %v558_v53  ;;  %v2494_v3 = vcombine.high %v551_v52, %v558_v53 }
 0x18b   :  { %v323_v60 = vcombine.low %v267_v54, %v283_v56  ;;  %v324_v61 = vcombine.high %v267_v54, %v283_v56  ;;  %v339_v62 = vcombine.low %v274_v55, %v290_v57  ;;  %v340_v63 = vcombine.high %v274_v55, %v290_v57 }
 0x18c   :  { %v786_v27 = vrot.slane %v2488_v0, %v3066_v28  ;;  %v802_v29 = vrot.slane %v2490_v1, %v3066_v28  ;;  %v818_v30 = vrot.slane %v2492_v2, %v3066_v28  ;;  %v834_v43 = vrot.slane %v2494_v3, %v3066_v28 }
 0x18d   :  { %v331_v4 = vrot.slane %v323_v60, %v3069_v35  ;;  %v338_v5 = vrot.slane %v324_v61, %v3069_v35  ;;  %v347_v6 = vrot.slane %v339_v62, %v3069_v35  ;;  %v354_v7 = vrot.slane %v340_v63, %v3069_v35  ;;  %v168_v8 = vpop.permute.xlu1 %167  ;;  %v174_v9 = vpop.permute.xlu0 %173 }
 0x18e   :  { %v227_v11 = vcombine.low %v3044_v12, %v168_v8  ;;  %v228_v13 = vcombine.high %v3044_v12, %v168_v8  ;;  %v243_v14 = vcombine.low %v162_v59, %v174_v9  ;;  %v244_v15 = vcombine.high %v162_v59, %v174_v9 }
 0x18f   :  { %v2480_v16 = vcombine.low %v331_v4, %v338_v5  ;;  %v2482_v17 = vcombine.high %v331_v4, %v338_v5  ;;  %v2484_v18 = vcombine.low %v347_v6, %v354_v7  ;;  %v2486_v19 = vcombine.high %v347_v6, %v354_v7 }
 0x190   :  { %v235_v20 = vrot.slane %v227_v11, %v3066_v28  ;;  %v242_v21 = vrot.slane %v228_v13, %v3066_v28  ;;  %v251_v22 = vrot.slane %v243_v14, %v3066_v28  ;;  %v258_v23 = vrot.slane %v244_v15, %v3066_v28 }
 0x191   :  { %v176_v25 = vpop.permute.xlu1 %175  ;;  %v170_v26 = vpop.permute.xlu0 %169  ;;  %v650_v31 = vrot.slane %v2480_v16, %v3066_v28  ;;  %v666_v32 = vrot.slane %v2482_v17, %v3066_v28  ;;  %v682_v33 = vrot.slane %v2484_v18, %v3066_v28  ;;  %v698_v34 = vrot.slane %v2486_v19, %v3066_v28 }
 0x192   :  { %v447_v36 = vcombine.low %v164_v58, %v176_v25  ;;  %v448_v37 = vcombine.high %v164_v58, %v176_v25  ;;  %v431_v38 = vcombine.low %v3040_v10, %v170_v26  ;;  %v432_v39 = vcombine.high %v3040_v10, %v170_v26 }
 0x193   :  { %v291_v40 = vcombine.low %v235_v20, %v251_v22  ;;  %v292_v41 = vcombine.high %v235_v20, %v251_v22  ;;  %v307_v42 = vcombine.low %v242_v21, %v258_v23  ;;  %v308_v48 = vcombine.high %v242_v21, %v258_v23 }
 0x194   :  { %v455_v44 = vrot.slane %v447_v36, %v3066_v28  ;;  %v462_v45 = vrot.slane %v448_v37, %v3066_v28  ;;  %v439_v46 = vrot.slane %v431_v38, %v3066_v28  ;;  %v446_v47 = vrot.slane %v432_v39, %v3066_v28 }
 0x195   :  { %v715_v49 = vcombine.low %v650_v31, %v666_v32  ;;  %v716_v50 = vcombine.high %v650_v31, %v666_v32  ;;  %v747_v51 = vcombine.low %v682_v33, %v698_v34  ;;  %v748_v57 = vcombine.high %v682_v33, %v698_v34 }
 0x196   :  { %v495_v52 = vcombine.low %v439_v46, %v455_v44  ;;  %v496_v53 = vcombine.high %v439_v46, %v455_v44  ;;  %v511_v54 = vcombine.low %v446_v47, %v462_v45  ;;  %v512_v55 = vcombine.high %v446_v47, %v462_v45 }
 0x197   :  { %v723_v56 = vrot.slane %v715_v49, %v3069_v35  ;;  %v755_v58 = vrot.slane %v747_v51, %v3069_v35  ;;  %v851_v59 = vcombine.low %v786_v27, %v802_v29  ;;  %v299_v0 = vrot.slane %v291_v40, %v3069_v35 }
 0x198   :  { %v503_v60 = vrot.slane %v495_v52, %v3069_v35  ;;  %v510_v61 = vrot.slane %v496_v53, %v3069_v35  ;;  %v519_v62 = vrot.slane %v511_v54, %v3069_v35  ;;  %v526_v63 = vrot.slane %v512_v55, %v3069_v35 }
 0x199   :  { %v306_v1 = vrot.slane %v292_v41, %v3069_v35  ;;  %v852_v2 = vcombine.high %v786_v27, %v802_v29  ;;  %v859_v3 = vrot.slane %v851_v59, %v3069_v35  ;;  %v883_v8 = vcombine.low %v818_v30, %v834_v43 }
 0x19a   :  { %v2487_v4 = vcombine.low %v503_v60, %v510_v61  ;;  %v2489_v5 = vcombine.high %v503_v60, %v510_v61  ;;  %v2491_v6 = vcombine.low %v519_v62, %v526_v63  ;;  %v2493_v7 = vcombine.high %v519_v62, %v526_v63 }
 0x19b   :  { %v884_v9 = vcombine.high %v818_v30, %v834_v43  ;;  %v730_v11 = vrot.slane %v716_v50, %v3069_v35  ;;  %v762_v13 = vrot.slane %v748_v57, %v3069_v35  ;;  %v315_v14 = vrot.slane %v307_v42, %v3069_v35 }
 0x19c   :  { %v322_v15 = vrot.slane %v308_v48, %v3069_v35  ;;  %v767_v16 = vcombine.low %v723_v56, %v755_v58  ;;  %v768_v17 = vcombine.high %v723_v56, %v755_v58  ;;  %v779_v18 = vrot.slane %v2487_v4, %v3066_v28 }
 0x19d   :  { %v891_v19 = vrot.slane %v883_v8, %v3069_v35  ;;  %v866_v20 = vrot.slane %v852_v2, %v3069_v35  ;;  %v898_v21 = vrot.slane %v884_v9, %v3069_v35  ;;  %v795_v22 = vrot.slane %v2489_v5, %v3066_v28 }
 0x19e   :  { %v811_v23 = vrot.slane %v2491_v6, %v3066_v28  ;;  %v827_v25 = vrot.slane %v2493_v7, %v3066_v28  ;;  %v2479_v26 = vcombine.low %v299_v0, %v306_v1  ;;  %v769_v30 = vcombine.low %v730_v11, %v762_v13  ;;  %v63_v7 = vld [vmem:[#allocation5] sm:$0xff] }
 0x19f   :  { %v903_v27 = vcombine.low %v859_v3, %v891_v19  ;;  %v904_v29 = vcombine.high %v859_v3, %v891_v19  ;;  %v770_v31 = vcombine.high %v730_v11, %v762_v13  ;;  %v2481_v34 = vcombine.high %v299_v0, %v306_v1  ;;  %v1051_v11 = vpop.permute.xlu0 %1050 }
 0x1a0   :  { %v643_v33 = vrot.slane %v2479_v26, %v3066_v28  ;;  %v2483_v36 = vcombine.low %v315_v14, %v322_v15  ;;  %v2485_v37 = vcombine.high %v315_v14, %v322_v15  ;;  %v905_v40 = vcombine.low %v866_v20, %v898_v21 }
 0x1a1   :  { %v2729_v38 = vpack.c.bf16 %v903_v27, %v767_v16  ;;  %v2735_v39 = vpack.c.bf16 %v904_v29, %v768_v17  ;;  %v906_v41 = vcombine.high %v866_v20, %v898_v21  ;;  %v659_v42 = vrot.slane %v2481_v34, %v3066_v28 }
 0x1a2   :  { %v675_v43 = vrot.slane %v2483_v36, %v3066_v28  ;;  %v691_v44 = vrot.slane %v2485_v37, %v3066_v28  ;;  %v835_v45 = vcombine.low %v779_v18, %v795_v22  ;;  %v2741_v46 = vpack.c.bf16 %v905_v40, %v769_v30 }
 0x1a3   :  { %2731 = vmatprep.subr.msk.bf16.mxu1 %vm3129_vm2, %v2729_v38  ;;  %2737 = vmatprep.subr.msk.bf16.mxu0 %vm3129_vm2, %v2735_v39  ;;  %v2747_v47 = vpack.c.bf16 %v906_v41, %v770_v31  ;;  %v867_v48 = vcombine.low %v811_v23, %v827_v25  ;;  %v699_v49 = vcombine.low %v643_v33, %v659_v42  ;;  %v2499_v8 = vadd.f32 -1.0, %v63_v7 }
 0x1a4   :  { %2734 = vmatpush3.bf16.xpose.msk.msra.mxu1 %vm3129_vm2, %v2729_v38  ;;  %2740 = vmatpush3.bf16.xpose.msk.msra.mxu0 %vm3129_vm2, %v2735_v39  ;;  %v700_v50 = vcombine.high %v643_v33, %v659_v42  ;;  %v731_v51 = vcombine.low %v675_v43, %v691_v44  ;;  %v732_v52 = vcombine.high %v675_v43, %v691_v44  ;;  %v1053_v13 = vsel %vm1047_vm1, -1e+09, %v1051_v11  ;;  %v3181_v42 = vpop.permute.xlu1 %205  ;;  %v3183_v43 = vpop.permute.xlu0 %211 }
 0x1a5   :  { %2743 = vmatprep.subr.msk.bf16.mxu1 %vm3129_vm2, %v2741_v46  ;;  %2749 = vmatprep.subr.msk.bf16.mxu0 %vm3129_vm2, %v2747_v47  ;;  %v843_v53 = vrot.slane %v835_v45, %v3069_v35  ;;  %v875_v54 = vrot.slane %v867_v48, %v3069_v35  ;;  %v707_v55 = vrot.slane %v699_v49, %v3069_v35  ;;  %v1045_v9 = vmul.f32 1e+09, %v2499_v8 }
 0x1a6   :  { %v739_v56 = vrot.slane %v731_v51, %v3069_v35  ;;  %v714_v59 = vrot.slane %v700_v50, %v3069_v35  ;;  %v746_v60 = vrot.slane %v732_v52, %v3069_v35  ;;  %v836_v63 = vcombine.high %v779_v18, %v795_v22 }
 0x1a7   :  { %v899_v57 = vcombine.low %v843_v53, %v875_v54  ;;  %v900_v58 = vcombine.high %v843_v53, %v875_v54  ;;  %v868_v0 = vcombine.high %v811_v23, %v827_v25  ;;  %v1048_v16 = vsel %vm1047_vm1, %v1045_v9, -1e+09 }
 0x1a8   :  { %v763_v61 = vcombine.low %v707_v55, %v739_v56  ;;  %v764_v62 = vcombine.high %v707_v55, %v739_v56  ;;  %v765_v1 = vcombine.low %v714_v59, %v746_v60  ;;  %v766_v2 = vcombine.high %v714_v59, %v746_v60  ;;  %v3185_v44 = vpop.permute.xlu1 %209  ;;  %v3187_v45 = vpop.permute.xlu0 %203 }
 0x1a9   :  { %v850_v3 = vrot.slane %v836_v63, %v3069_v35  ;;  %v882_v4 = vrot.slane %v868_v0, %v3069_v35 }
 0x1aa   :  { %2619 = vmatprep.mubr.msk.f32.mxu1 %vm1047_vm1, %v763_v61  ;;  %2626 = vmatprep.mubr.msk.f32.mxu0 %vm1047_vm1, %v764_v62 }
 0x1ab   :  { %2620 = vmatmul.mubr.msk.f32.vlgmr.msra.gmra.mrb[0].mxu1 %vm1047_vm1, %v899_v57  ;;  %2627 = vmatmul.mubr.msk.f32.vlgmr.msra.gmra.mrb[2].mxu0 %vm1047_vm1, %v900_v58  ;;  %v901_v5 = vcombine.low %v850_v3, %v882_v4  ;;  %v902_v6 = vcombine.high %v850_v3, %v882_v4 }
 0x1ac   :  { %2746 = vmatpush3.bf16.xpose.msk.msra.mxu1 %vm3129_vm2, %v2741_v46  ;;  %2752 = vmatpush3.bf16.xpose.msk.msra.mxu0 %vm3129_vm2, %v2747_v47 }
 0x1ad   :  { %2633 = vmatprep.mubr.msk.f32.mxu1 %vm1047_vm1, %v765_v1  ;;  %2640 = vmatprep.mubr.msk.f32.mxu0 %vm1047_vm1, %v766_v2 }
 0x1b3   :  { %2634 = vmatmul.mubr.msk.f32.vlgmr.msra.gmra.mrb[2].mxu1 %vm1047_vm1, %v901_v5  ;;  %2641 = vmatmul.mubr.msk.f32.vlgmr.msra.gmra.mrb[4].mxu0 %vm1047_vm1, %v902_v6 }
 0x27e   :  { %v2621_v14 = vpop.f32.mrb[0].mxu1  ;;  %v2628_v15 = vpop.f32.mrb[2].mxu0 }
 0x27f   :  { %v1138_v17 = vadd.f32 %v2621_v14, %v1053_v13  ;;  %v1225_v18 = vadd.f32 %v2628_v15, %v1053_v13  ;;  %v1132_v19 = vpop.f32.mrb[1].mxu1  ;;  %v1219_v20 = vpop.f32.mrb[3].mxu0 }
 0x280   :  { %v1133_v21 = vadd.f32 %v1132_v19, %v1048_v16  ;;  %v1220_v22 = vadd.f32 %v1219_v20, %v1048_v16 }
 0x281   :  { %v1412_v23 = vsel %vm1402_vm3, %v1225_v18, -inf  ;;  %v1406_v25 = vsel %vm1402_vm3, %v1138_v17, -inf }
 0x282   :  { %1413 = vmax.xlane.f32.xlu1 %v1412_v23  ;;  %1407 = vmax.xlane.f32.xlu0 %v1406_v25  ;;  %v1403_v26 = vsel %vm1402_vm3, %v1133_v21, -inf  ;;  %v1409_v27 = vsel %vm1402_vm3, %v1220_v22, -inf }
 0x286   :  { %v2635_v29 = vpop.f32.mrb[2].mxu1  ;;  %v2642_v30 = vpop.f32.mrb[4].mxu0  ;;  %1404 = vmax.xlane.f32.xlu1 %v1403_v26  ;;  %1410 = vmax.xlane.f32.xlu0 %v1409_v27 }
 0x287   :  { %v1312_v31 = vadd.f32 %v2635_v29, %v1053_v13  ;;  %v1306_v32 = vpop.f32.mrb[3].mxu1  ;;  %v1393_v33 = vpop.f32.mrb[5].mxu0  ;;  %v1399_v36 = vadd.f32 %v2642_v30, %v1053_v13 }
 0x288   :  { %v1307_v34 = vadd.f32 %v1306_v32, %v1048_v16  ;;  %v1394_v38 = vadd.f32 %v1393_v33, %v1048_v16 }
 0x289   :  { %v1418_v37 = vsel %vm1402_vm3, %v1312_v31, -inf  ;;  %v1424_v40 = vsel %vm1402_vm3, %v1399_v36, -inf }
 0x28a   :  { %1419 = vmax.xlane.f32.xlu1 %v1418_v37  ;;  %v1415_v39 = vsel %vm1402_vm3, %v1307_v34, -inf  ;;  %v1421_v41 = vsel %vm1402_vm3, %v1394_v38, -inf }
 0x28b   :  { %1416 = vmax.xlane.f32.xlu0 %v1415_v39 }
 0x28e   :  { %1425 = vmax.xlane.f32.xlu1 %v1424_v40 }
 0x28f   :  { %1422 = vmax.xlane.f32.xlu0 %v1421_v41 }
 0x29f   :  { %215 = vrot.lane.b32.xlu1 %v3044_v12, %s2940_s11 }
 0x2a5   :  { %217 = vrot.lane.b32.xlu0 %v3040_v10, %s2940_s11 }
 0x30f   :  { %v1414_v46 = vpop.xlane.xlu1 %1413  ;;  %v1408_v47 = vpop.xlane.xlu0 %1407 }
 0x310   :  { %v1430_v48 = vsub.f32 %v1225_v18, %v1414_v46  ;;  %v1428_v49 = vsub.f32 %v1138_v17, %v1408_v47 }
 0x312   :  { %v1437_v50 = vmul.f32 1.442695, %v1428_v49  ;;  %v1441_v51 = vmul.f32 1.442695, %v1430_v48 }
 0x313   :  { %v1405_v52 = vpop.xlane.xlu1 %1404  ;;  %v1411_v53 = vpop.xlane.xlu0 %1410 }
 0x314   :  { %v1427_v54 = vsub.f32 %v1133_v21, %v1405_v52  ;;  %v1429_v55 = vsub.f32 %v1220_v22, %v1411_v53  ;;  %2811 = vpow2.f32 %v1437_v50 }
 0x315   :  { %2813 = vpow2.f32 %v1441_v51 }
 0x316   :  { %v1435_v56 = vmul.f32 1.442695, %v1427_v54  ;;  %v1439_v57 = vmul.f32 1.442695, %v1429_v55 }
 0x317   :  { %v1420_v58 = vpop.xlane.xlu1 %1419 }
 0x318   :  { %2815 = vpow2.f32 %v1435_v56  ;;  %v1432_v59 = vsub.f32 %v1312_v31, %v1420_v58  ;;  %v1417_v60 = vpop.xlane.xlu0 %1416 }
 0x319   :  { %v1431_v61 = vsub.f32 %v1307_v34, %v1417_v60  ;;  %2817 = vpow2.f32 %v1439_v57 }
 0x31a   :  { %v1445_v62 = vmul.f32 1.442695, %v1432_v59 }
 0x31b   :  { %v1443_v63 = vmul.f32 1.442695, %v1431_v61  ;;  %v1426_v0 = vpop.xlane.xlu1 %1425 }
 0x31c   :  { %2819 = vpow2.f32 %v1445_v62  ;;  %v1434_v1 = vsub.f32 %v1399_v36, %v1426_v0  ;;  %v1423_v2 = vpop.xlane.xlu0 %1422 }
 0x31d   :  { %v1433_v3 = vsub.f32 %v1394_v38, %v1423_v2  ;;  %2821 = vpow2.f32 %v1443_v63 }
 0x31e   :  { %v1449_v4 = vmul.f32 1.442695, %v1434_v1  ;;  %v3189_v5 = vpop.eup %2811 }
 0x31f   :  { %v1447_v6 = vmul.f32 1.442695, %v1433_v3  ;;  %v1454_v7 = vsel %vm1402_vm3, %v3189_v5, 0.0  ;;  %v3193_v8 = vpop.eup %2813  ;;  %v216_v25 = vpop.permute.xlu1 %215 }
 0x320   :  { %2823 = vpow2.f32 %v1449_v4  ;;  %1455 = vadd.xlane.f32.xlu1 %v1454_v7  ;;  %v1460_v14 = vsel %vm1402_vm3, %v3193_v8, 0.0  ;;  %v218_v26 = vpop.permute.xlu0 %217  ;;  %v364_v38 = vcombine.high %v3187_v45, %v216_v25 }
 0x321   :  { %2825 = vpow2.f32 %v1447_v6  ;;  %v567_v57 = vcombine.low %v3181_v42, %v218_v26  ;;  %v568_v63 = vcombine.high %v3181_v42, %v218_v26 }
 0x322   :  { %v2816_v9 = vpop.eup %2815  ;;  %v378_v53 = vrot.slane %v364_v38, %v3066_v28 }
 0x323   :  { %v1451_v11 = vsel %vm1402_vm3, %v2816_v9, 0.0  ;;  %v3196_v13 = vpop.eup %2817 }
 0x324   :  { %1452 = vadd.xlane.f32.xlu0 %v1451_v11  ;;  %1461 = vadd.xlane.f32.xlu1 %v1460_v14  ;;  %v1457_v17 = vsel %vm1402_vm3, %v3196_v13, 0.0  ;;  %v575_v14 = vrot.slane %v567_v57, %v3066_v28 }
 0x326   :  { %v3200_v15 = vpop.eup %2819 }
 0x327   :  { %v1466_v16 = vsel %vm1402_vm3, %v3200_v15, 0.0  ;;  %v3206_v18 = vpop.eup %2821 }
 0x328   :  { %1458 = vadd.xlane.f32.xlu0 %v1457_v17  ;;  %1467 = vadd.xlane.f32.xlu1 %v1466_v16  ;;  %v1463_v21 = vsel %vm1402_vm3, %v3206_v18, 0.0  ;;  %v582_v17 = vrot.slane %v568_v63, %v3066_v28 }
 0x32a   :  { %v3208_v19 = vpop.eup %2823 }
 0x32b   :  { %v1472_v20 = vsel %vm1402_vm3, %v3208_v19, 0.0  ;;  %v3214_v22 = vpop.eup %2825 }
 0x32c   :  { %1464 = vadd.xlane.f32.xlu0 %v1463_v21  ;;  %1473 = vadd.xlane.f32.xlu1 %v1472_v20  ;;  %v1469_v23 = vsel %vm1402_vm3, %v3214_v22, 0.0 }
 0x330   :  { %1470 = vadd.xlane.f32.xlu0 %v1469_v23 }
 0x33d   :  { %221 = vrot.lane.b32.xlu1 %v3044_v12, %s2941_s12  ;;  %v363_v12 = vcombine.low %v3187_v45, %v216_v25 }
 0x33f   :  { %v371_v48 = vrot.slane %v363_v12, %v3066_v28 }
 0x346   :  { %223 = vrot.lane.b32.xlu0 %v3040_v10, %s2941_s12 }
 0x3ad   :  { %v3220_v27 = vpop.xlane.xlu1 %1455 }
 0x3b1   :  { %v1453_v29 = vpop.xlane.xlu0 %1452  ;;  %v3222_v30 = vpop.xlane.xlu1 %1461 }
 0x3b2   :  { %2827 = vrcp.f32 %v1453_v29 }
 0x3b5   :  { %v1459_v31 = vpop.xlane.xlu0 %1458  ;;  %v3224_v32 = vpop.xlane.xlu1 %1467 }
 0x3b6   :  { %2829 = vrcp.f32 %v1459_v31 }
 0x3b7   :  { %2831 = vrcp.f32 %v3220_v27 }
 0x3b8   :  { %2833 = vrcp.f32 %v3222_v30 }
 0x3b9   :  { %v3226_v33 = vpop.xlane.xlu0 %1464  ;;  %v3228_v34 = vpop.xlane.xlu1 %1473 }
 0x3ba   :  { %2835 = vrcp.f32 %v3226_v33 }
 0x3bc   :  { %v2828_v36 = vpop.eup %2827 }
 0x3bd   :  { %v1483_v10 = vmul.f32 %v2828_v36, %v1453_v29  ;;  %v3231_v37 = vpop.xlane.xlu0 %1470  ;;  %v222_v39 = vpop.permute.xlu1 %221 }
 0x3be   :  { %v379_v41 = vcombine.low %v3185_v44, %v222_v39  ;;  %v380_v46 = vcombine.high %v3185_v44, %v222_v39  ;;  %2837 = vrcp.f32 %v3231_v37 }
 0x3bf   :  { %v1491_v40 = vsub.f32 2.0, %v1483_v10  ;;  %2839 = vrcp.f32 %v3224_v32 }
 0x3c0   :  { %v2830_v47 = vpop.eup %2829  ;;  %v387_v51 = vrot.slane %v379_v41, %v3066_v28  ;;  %v394_v52 = vrot.slane %v380_v46, %v3066_v28  ;;  %2841 = vrcp.f32 %v3228_v34 }
 0x3c1   :  { %v1499_v49 = vmul.f32 %v2828_v36, %v1491_v40  ;;  %v1485_v50 = vmul.f32 %v2830_v47, %v1459_v31  ;;  %v224_v44 = vpop.permute.xlu0 %223  ;;  %v2832_v42 = vpop.eup %2831 }
 0x3c2   :  { %v395_v55 = vcombine.low %v371_v48, %v387_v51  ;;  %v396_v56 = vcombine.high %v371_v48, %v387_v51  ;;  %v411_v58 = vcombine.low %v378_v53, %v394_v52  ;;  %v412_v59 = vcombine.high %v378_v53, %v394_v52  ;;  %v2834_v21 = vpop.eup %2833 }
 0x3c3   :  { %v1507_v45 = vmul.f32 %v2816_v9, %v1499_v49  ;;  %v1493_v54 = vsub.f32 2.0, %v1485_v50  ;;  %v583_v2 = vcombine.low %v3183_v43, %v224_v44  ;;  %v584_v7 = vcombine.high %v3183_v43, %v224_v44 }
 0x3c4   :  { %v403_v61 = vrot.slane %v395_v55, %v3069_v35  ;;  %v410_v62 = vrot.slane %v396_v56, %v3069_v35  ;;  %v419_v0 = vrot.slane %v411_v58, %v3069_v35  ;;  %v426_v1 = vrot.slane %v412_v59, %v3069_v35  ;;  %v2836_v12 = vpop.eup %2835 }
 0x3c5   :  { %v1501_v60 = vmul.f32 %v2830_v47, %v1493_v54  ;;  %2647 = vmatprep.mubr.msk.f32.mxu0 %vm1402_vm3, %v1507_v45  ;;  %v591_v16 = vrot.slane %v583_v2, %v3066_v28  ;;  %v598_v43 = vrot.slane %v584_v7, %v3066_v28  ;;  %v1484_v50 = vmul.f32 %v2832_v42, %v3220_v27 }
 0x3c6   :  { %v907_v4 = vcombine.low %v403_v61, %v410_v62  ;;  %v2495_v6 = vcombine.high %v403_v61, %v410_v62  ;;  %v923_v9 = vcombine.low %v419_v0, %v426_v1  ;;  %v2496_v11 = vcombine.high %v419_v0, %v426_v1 }
 0x3c7   :  { %v1509_v3 = vmul.f32 %v3196_v13, %v1501_v60  ;;  %v599_v26 = vcombine.low %v575_v14, %v591_v16  ;;  %v600_v29 = vcombine.high %v575_v14, %v591_v16  ;;  %v615_v31 = vcombine.low %v582_v17, %v598_v43 }
 0x3c8   :  { %v914_v13 = vrot.slane %v907_v4, %v3066_v28  ;;  %v922_v20 = vrot.slane %v2495_v6, %v3066_v28  ;;  %v930_v23 = vrot.slane %v923_v9, %v3066_v28  ;;  %v938_v25 = vrot.slane %v2496_v11, %v3066_v28  ;;  %v2838_v39 = vpop.eup %2837 }
 0x3c9   :  { %2654 = vmatprep.mubr.msk.f32.mxu1 %vm1402_vm3, %v1509_v3  ;;  %v616_v36 = vcombine.high %v582_v17, %v598_v43  ;;  %v607_v10 = vrot.slane %v599_v26, %v3069_v35  ;;  %v614_v38 = vrot.slane %v600_v29, %v3069_v35  ;;  %v623_v40 = vrot.slane %v615_v31, %v3069_v35  ;;  %v2840_v45 = vpop.eup %2839 }
 0x3ca   :  { %v939_v48 = vcombine.low %v914_v13, %v922_v20  ;;  %v955_v49 = vcombine.low %v930_v23, %v938_v25  ;;  %v1486_v51 = vmul.f32 %v2834_v21, %v3222_v30  ;;  %v1487_v54 = vmul.f32 %v2836_v12, %v3226_v33  ;;  %v2842_v57 = vpop.eup %2841 }
 0x3cb   :  { %v630_v41 = vrot.slane %v616_v36, %v3069_v35  ;;  %v975_v46 = vcombine.low %v607_v10, %v614_v38  ;;  %v2497_v47 = vcombine.high %v607_v10, %v614_v38  ;;  %v1489_v55 = vmul.f32 %v2838_v39, %v3231_v37 }
 0x3cc   :  { %v940_v60 = vcombine.high %v914_v13, %v922_v20  ;;  %v956_v27 = vcombine.high %v930_v23, %v938_v25  ;;  %v947_v30 = vrot.slane %v939_v48, %v3069_v35  ;;  %v963_v61 = vrot.slane %v955_v49, %v3069_v35 }
 0x3cd   :  { %v991_v52 = vcombine.low %v623_v40, %v630_v41  ;;  %v2498_v53 = vcombine.high %v623_v40, %v630_v41  ;;  %v982_v56 = vrot.slane %v975_v46, %v3066_v28  ;;  %v990_v44 = vrot.slane %v2497_v47, %v3066_v28 }
 0x3ce   :  { %v1492_v33 = vsub.f32 2.0, %v1484_v50  ;;  %v1494_v0 = vsub.f32 2.0, %v1486_v51  ;;  %v1488_v2 = vmul.f32 %v2840_v45, %v3224_v32  ;;  %v1490_v3 = vmul.f32 %v2842_v57, %v3228_v34 }
 0x3cf   :  { %v998_v58 = vrot.slane %v991_v52, %v3066_v28  ;;  %v1006_v59 = vrot.slane %v2498_v53, %v3066_v28  ;;  %v1007_v62 = vcombine.low %v982_v56, %v990_v44  ;;  %v1008_v63 = vcombine.high %v982_v56, %v990_v44 }
 0x3d0   :  { %v954_v7 = vrot.slane %v940_v60, %v3069_v35  ;;  %v970_v9 = vrot.slane %v956_v27, %v3069_v35  ;;  %v1495_v14 = vsub.f32 2.0, %v1487_v54  ;;  %v1497_v16 = vsub.f32 2.0, %v1489_v55 }
 0x3d1   :  { %v1023_v37 = vcombine.low %v998_v58, %v1006_v59  ;;  %v1024_v1 = vcombine.high %v998_v58, %v1006_v59  ;;  %v1015_v4 = vrot.slane %v1007_v62, %v3069_v35  ;;  %v1022_v28 = vrot.slane %v1008_v63, %v3069_v35 }
 0x3d2   :  { %v971_v17 = vcombine.low %v947_v30, %v963_v61  ;;  %v972_v13 = vcombine.high %v947_v30, %v963_v61  ;;  %v1500_v23 = vmul.f32 %v2832_v42, %v1492_v33  ;;  %v1502_v25 = vmul.f32 %v2834_v21, %v1494_v0  ;;  %v3327_v33 = vld [vmem:[%s3418_s8] sm:$0x3f] }
 0x3d3   :  { %v1031_v6 = vrot.slane %v1023_v37, %v3069_v35  ;;  %v1038_v11 = vrot.slane %v1024_v1, %v3069_v35  ;;  %v1496_v26 = vsub.f32 2.0, %v1488_v2  ;;  %v973_v36 = vcombine.low %v954_v7, %v970_v9 }
 0x3d4   :  { %v974_v10 = vcombine.high %v954_v7, %v970_v9  ;;  %v1498_v38 = vsub.f32 2.0, %v1490_v3  ;;  %v1503_v40 = vmul.f32 %v2836_v12, %v1495_v14  ;;  %v1505_v41 = vmul.f32 %v2838_v39, %v1497_v16  ;;  %v1839_v12 = vld [vmem:[%s3414_s4] sm:$0xff] }
 0x3d5   :  { %v1039_v20 = vcombine.low %v1015_v4, %v1031_v6  ;;  %v1040_v32 = vcombine.high %v1015_v4, %v1031_v6  ;;  %v1041_v43 = vcombine.low %v1022_v28, %v1038_v11  ;;  %v1042_v34 = vcombine.high %v1022_v28, %v1038_v11 }
 0x3d6   :  { %v1508_v47 = vmul.f32 %v3189_v5, %v1500_v23  ;;  %v1510_v48 = vmul.f32 %v3193_v8, %v1502_v25  ;;  %v1504_v42 = vmul.f32 %v2840_v45, %v1496_v26  ;;  %v1506_v21 = vmul.f32 %v2842_v57, %v1498_v38 }
 0x3d7   :  { %v2753_v29 = vpack.c.bf16 %v1039_v20, %v971_v17  ;;  %v2757_v31 = vpack.c.bf16 %v1040_v32, %v972_v13  ;;  %v2761_v35 = vpack.c.bf16 %v1041_v43, %v973_v36  ;;  %v2765_v46 = vpack.c.bf16 %v1042_v34, %v974_v10  ;;  %v2851_v20 = vld [vmem:[#allocation2 + $0x8] sm:$0xff]  ;;  %v2852_v43 = vld [vmem:[#allocation2] sm:$0xff] }
 0x3d8   :  { %v1511_v49 = vmul.f32 %v3206_v18, %v1503_v40  ;;  %v1513_v50 = vmul.f32 %v3214_v22, %v1505_v41  ;;  %v1512_v5 = vmul.f32 %v3200_v15, %v1504_v42  ;;  %v1514_v8 = vmul.f32 %v3208_v19, %v1506_v21  ;;  %v1840_v18 = vld [vmem:[%s3414_s4 + $0x8] sm:$0xff]  ;;  %v1841_v15 = vld [vmem:[%s3414_s4 + $0x10] sm:$0xff]  ;;  %v1842_v19 = vld [vmem:[%s3414_s4 + $0x18] sm:$0xff] }
 0x3d9   :  { %2754 = vmatprep.subr.bf16.mxu0 %v2753_v29  ;;  %2758 = vmatprep.subr.bf16.mxu1 %v2757_v31  ;;  %v2183_v62 = vsub.s32 0, %v3063_v24  ;;  %v2230_v21 = vld [vmem:[%s3415_s5 + $0x10] sm:$0xff] }
 0x3da   :  { %2756 = vmatpush3.bf16.msra.mxu0 %v2753_v29  ;;  %2760 = vmatpush3.bf16.msra.mxu1 %v2757_v31 }
 0x3db   :  { %2762 = vmatprep.subr.bf16.mxu0 %v2761_v35  ;;  %2766 = vmatprep.subr.bf16.mxu1 %v2765_v46  ;;  %v2184_v4 = vrot.slane %v3327_v33, %v2183_v62 }
 0x3dd   :  { %2648 = vmatmul.mubr.msk.f32.vlgmr.msra.gmra.mrb[6].mxu0 %vm1402_vm3, %v1508_v47  ;;  %2655 = vmatmul.mubr.msk.f32.vlgmr.msra.gmra.mrb[4].mxu1 %vm1402_vm3, %v1510_v48  ;;  %v2228_v47 = vld [vmem:[%s3415_s5] sm:$0xff]  ;;  %v2229_v48 = vld [vmem:[%s3415_s5 + $0x8] sm:$0xff] }
 0x3de   :  { %2764 = vmatpush3.bf16.msra.mxu0 %v2761_v35  ;;  %2661 = vmatprep.mubr.msk.f32.mxu0 %vm1402_vm3, %v1511_v49  ;;  %v2769_v42 = vpack.c.bf16 %v2229_v48, %v2228_v47  ;;  %v2231_v49 = vld [vmem:[%s3415_s5 + $0x18] sm:$0xff] }
 0x3df   :  { %2768 = vmatpush3.bf16.msra.mxu1 %v2765_v46  ;;  %2668 = vmatprep.mubr.msk.f32.mxu1 %vm1402_vm3, %v1513_v50  ;;  %v2773_v50 = vpack.c.bf16 %v2231_v49, %v2230_v21 }
 0x3e0   :  { %2671 = vmatprep.subr.mxu0 %v1839_v12  ;;  %2676 = vmatprep.subr.mxu1 %v1840_v18 }
 0x3e1   :  { %2662 = vmatmul.mubr.msk.f32.vlgmr.msra.gmra.mrb[8].mxu0 %vm1402_vm3, %v1512_v5  ;;  %v2323_v5 = vld [vmem:[%s3417_s7 + $0x8] sm:$0xff] }
 0x3e2   :  { %2669 = vmatmul.mubr.msk.f32.vlgmr.msra.gmra.mrb[6].mxu1 %vm1402_vm3, %v1514_v8  ;;  %2672 = vmatpush3.msra.mxu0 %v1839_v12  ;;  %v2322_v12 = vld [vmem:[%s3417_s7] sm:$0xff]  ;;  %v2324_v8 = vld [vmem:[%s3417_s7 + $0x10] sm:$0xff] }
 0x3e3   :  { %2677 = vmatpush3.msra.mxu1 %v1840_v18  ;;  %2681 = vmatprep.subr.mxu0 %v1841_v15  ;;  %v2777_v18 = vpack.c.bf16 %v2323_v5, %v2322_v12  ;;  %v2446_v5 = vsub.s32 4, %v3063_v24 }
 0x3e4   :  { %2686 = vmatprep.subr.mxu1 %v1842_v19 }
 0x4b0   :  { %v2649_v22 = vpop.f32.mrb[6].mxu0  ;;  %v2656_v39 = vpop.f32.mrb[4].mxu1 }
 0x4b1   :  { %v1587_v51 = vpop.f32.mrb[7].mxu0  ;;  %v1668_v52 = vpop.f32.mrb[5].mxu1 }
 0x4b2   :  { %2673 = vmatprep.mubr.msk.f32.mxu0 %vm1047_vm1, %v1587_v51  ;;  %2678 = vmatprep.mubr.msk.f32.mxu1 %vm1047_vm1, %v1668_v52 }
 0x4b3   :  { %2674 = vmatmul.mubr.msk.f32.vlgmr.msra.gmra.mrb[10].mxu0 %vm1047_vm1, %v2649_v22  ;;  %2679 = vmatmul.mubr.msk.f32.vlgmr.msra.gmra.mrb[8].mxu1 %vm1047_vm1, %v2656_v39  ;;  %v2326_v22 = vld [vmem:[%s3417_s7 + $0x20] sm:$0xff]  ;;  %v2327_v39 = vld [vmem:[%s3417_s7 + $0x28] sm:$0xff] }
 0x4b4   :  { %v2663_v53 = vpop.f32.mrb[8].mxu0  ;;  %2682 = vmatpush3.msra.mxu0 %v1841_v15  ;;  %2687 = vmatpush3.msra.mxu1 %v1842_v19  ;;  %v2325_v15 = vld [vmem:[%s3417_s7 + $0x18] sm:$0xff]  ;;  %v2785_v51 = vpack.c.bf16 %v2327_v39, %v2326_v22 }
 0x4b5   :  { %v2670_v45 = vpop.f32.mrb[6].mxu1  ;;  %v1749_v54 = vpop.f32.mrb[9].mxu0  ;;  %2770 = vmatprep.subr.bf16.mxu0 %v2769_v42  ;;  %v2781_v19 = vpack.c.bf16 %v2325_v15, %v2324_v8  ;;  %2778 = vmatprep.subr.bf16.mxu1 %v2777_v18  ;;  %v2452_v8 = vsub.s32 5, %v3063_v24 }
 0x4b6   :  { %v1830_v55 = vpop.f32.mrb[7].mxu1  ;;  %2683 = vmatprep.mubr.msk.f32.mxu0 %vm1047_vm1, %v1749_v54 }
 0x4b7   :  { %2688 = vmatprep.mubr.msk.f32.mxu1 %vm1047_vm1, %v1830_v55  ;;  %2684 = vmatmul.mubr.msk.f32.vlgmr.msra.gmra.mrb[12].mxu0 %vm1047_vm1, %v2663_v53  ;;  %v2453_v39 = vrot.slane %v3327_v33, %v2452_v8 }
 0x4b8   :  { %2689 = vmatmul.mubr.msk.f32.vlgmr.msra.gmra.mrb[10].mxu1 %vm1047_vm1, %v2670_v45  ;;  %2772 = vmatpush3.bf16.msra.mxu0 %v2769_v42 }
 0x4b9   :  { %2774 = vmatprep.subr.bf16.mxu0 %v2773_v50  ;;  %2780 = vmatpush3.bf16.msra.mxu1 %v2777_v18  ;;  %v2447_v18 = vrot.slane %v3327_v33, %v2446_v5 }
 0x4ba   :  { %2782 = vmatprep.subr.bf16.mxu1 %v2781_v19 }
 0x4bc   :  { %2776 = vmatpush3.bf16.msra.mxu0 %v2773_v50 }
 0x4bd   :  { %2784 = vmatpush3.bf16.msra.mxu1 %v2781_v19 }
 0x4be   :  { %2786 = vmatprep.subr.bf16.mxu1 %v2785_v51 }
 0x4c1   :  { %2788 = vmatpush3.bf16.msra.mxu1 %v2785_v51 }
 0x586   :  { %v2675_v56 = vpop.f32.mrb[10].mxu0  ;;  %v2680_v44 = vpop.f32.mrb[8].mxu1 }
 0x587   :  { %v2174_v57 = vsel %vm77_vm0, %v2675_v56, 0.0  ;;  %v2175_v58 = vsel %vm77_vm0, %v2680_v44, 0.0  ;;  %v1915_v59 = vpop.f32.mrb[11].mxu0  ;;  %v1996_v60 = vpop.f32.mrb[9].mxu1  ;;  %v2218_v44 = vsub.s32 2, %v3063_v24 }
 0x588   :  { %v2176_v27 = vadd.f32 %v2175_v58, %v2174_v57  ;;  %v2167_v30 = vsel %vm77_vm0, %v1915_v59, 0.0  ;;  %v2168_v61 = vsel %vm77_vm0, %v1996_v60, 0.0  ;;  %v2224_v57 = vsub.s32 3, %v3063_v24 }
 0x589   :  { %v2169_v63 = vadd.f32 %v2168_v61, %v2167_v30  ;;  %v2219_v58 = vrot.slane %v3327_v33, %v2218_v44 }
 0x58a   :  { %v2685_v0 = vpop.f32.mrb[12].mxu0  ;;  %v2225_v61 = vrot.slane %v3327_v33, %v2224_v57 }
 0x58b   :  { %v2177_v37 = vsel %vm77_vm0, %v2685_v0, 0.0  ;;  %v2690_v1 = vpop.f32.mrb[10].mxu1  ;;  %v2077_v2 = vpop.f32.mrb[13].mxu0 }
 0x58c   :  { %v2178_v3 = vadd.f32 %v2177_v37, %v2176_v27  ;;  %v2170_v28 = vsel %vm77_vm0, %v2077_v2, 0.0  ;;  %v2158_v6 = vpop.f32.mrb[11].mxu1  ;;  %v2179_v7 = vsel %vm77_vm0, %v2690_v1, 0.0  ;;  %v2328_v1 = vld [vmem:[%s3417_s7 + $0x30] sm:$0xff]  ;;  %v2329_v2 = vld [vmem:[%s3417_s7 + $0x38] sm:$0xff] }
 0x58d   :  { %v2171_v9 = vadd.f32 %v2170_v28, %v2169_v63  ;;  %v2172_v14 = vsel %vm77_vm0, %v2158_v6, 0.0 }
 0x58e   :  { %v2180_v11 = vadd.f32 %v2179_v7, %v2178_v3  ;;  %v2789_v3 = vpack.c.bf16 %v2329_v2, %v2328_v1 }
 0x58f   :  { %v2173_v16 = vadd.f32 %v2172_v14, %v2171_v9 }
 0x590   :  { %v2186_v17 = vadd.f32 %v2184_v4, %v2180_v11  ;;  %2790 = vmatprep.subr.bf16.mxu1 %v2789_v3 }
 0x591   :  { %v2185_v13 = vadd.f32 %v2184_v4, %v2173_v16  ;;  %2792 = vmatpush3.bf16.msra.mxu1 %v2789_v3  ;;  %v2533_v4 = vld [vmem:[%s3416_s6] ss:$0 sm:$0xff]  ;;  %v2332_v16 = vsub.s32 1, %v3063_v24  ;;  %s2942_s6 = smov [#allocation7]  }
 0x592   :  { %v2188_v32 = vadd.f32 %v2851_v20, %v2186_v17  ;;  %s2463_s7 = sshll.u32 %s2942_s6, 4  ;;  %s2464_s7 = int_to_ptr.vmem [resolvable:$true] %s2463_s7 }
 0x593   :  { %v2187_v34 = vadd.f32 %v2852_v43, %v2185_v13  ;;  %v2333_v17 = vrot.slane %v3327_v33, %v2332_v16  ;;  %s2897_s8 = scalar_lea.vmem %s2464_s7, 256  ;;  %p2902_p3 = scmp.lt.s32.totalorder %s2464_s7, %s2464_s7 }
 0x594   :  { %v2192_v23 = vsel %vm77_vm0, %v2188_v32, 0.0  ;;  %p2898_p2 = scmp.ne.s32.totalorder %s2464_s7, %s2897_s8  ;;  %p2903_p4 = scmp.lt.s32.totalorder %s2897_s8, %s2897_s8 }
 0x595   :  { %2193 = vadd.xlane.f32.xlu0 %v2192_v23  ;;  %v2189_v25 = vsel %vm77_vm0, %v2187_v34, 0.0 }
 0x596   :  { %2190 = vadd.xlane.f32.xlu1 %v2189_v25  ;;  %p2904_p5 = por %p2903_p4, %p2902_p3 }
 0x598   :  { %p2905_p6 = pnand %p2904_p5, %p2898_p2 }
 0x622   :  { %v2194_v26 = vpop.xlane.xlu0 %2193 }
 0x623   :  { %v2197_v29 = vmul.f32 0.03125, %v2194_v26  ;;  %v2191_v31 = vpop.xlane.xlu1 %2190 }
 0x624   :  { %v2196_v36 = vmul.f32 0.03125, %v2191_v31 }
 0x625   :  { %v2199_v10 = vsub.f32 %v2188_v32, %v2197_v29 }
 0x626   :  { %v2198_v38 = vsub.f32 %v2187_v34, %v2196_v36 }
 0x627   :  { %v2201_v40 = vmul.f32 %v2199_v10, %v2199_v10 }
 0x628   :  { %v2200_v41 = vmul.f32 %v2198_v38, %v2198_v38 }
 0x629   :  { %v2205_v35 = vsel %vm77_vm0, %v2201_v40, 0.0 }
 0x62a   :  { %2206 = vadd.xlane.f32.xlu1 %v2205_v35  ;;  %v2202_v46 = vsel %vm77_vm0, %v2200_v41, 0.0 }
 0x62b   :  { %2203 = vadd.xlane.f32.xlu0 %v2202_v46 }
 0x6b7   :  { %v2207_v52 = vpop.xlane.xlu1 %2206 }
 0x6b8   :  { %v2209_v53 = vmul.f32 0.03125, %v2207_v52  ;;  %v2204_v45 = vpop.xlane.xlu0 %2203 }
 0x6b9   :  { %v2208_v54 = vmul.f32 0.03125, %v2204_v45 }
 0x6ba   :  { %v2211_v55 = vadd.f32 1e-06, %v2209_v53 }
 0x6bb   :  { %v2210_v56 = vadd.f32 1e-06, %v2208_v54 }
 0x6bc   :  { %2843 = vrsqrt.f32 %v2211_v55 }
 0x6bd   :  { %2845 = vrsqrt.f32 %v2210_v56 }
 0x6c6   :  { %v2844_v59 = vpop.eup %2843 }
 0x6c7   :  { %v2846_v60 = vpop.eup %2845  ;;  %v2215_v27 = vmul.f32 %v2844_v59, %v2199_v10 }
 0x6c8   :  { %v2214_v30 = vmul.f32 %v2846_v60, %v2198_v38 }
 0x6c9   :  { %v2221_v62 = vmul.f32 %v2219_v58, %v2215_v27 }
 0x6ca   :  { %v2220_v63 = vmul.f32 %v2219_v58, %v2214_v30 }
 0x6cb   :  { %v2227_v37 = vadd.f32 %v2225_v61, %v2221_v62 }
 0x6cc   :  { %v2226_v0 = vadd.f32 %v2225_v61, %v2220_v63 }
 0x6ce   :  { %2699 = vmatprep.mubr.msk.f32.mxu0 %vm77_vm0, %v2226_v0 }
 0x6cf   :  { %2700 = vmatmul.mubr.msk.f32.vlgmr.msra.gmra.mrb[14].mxu0 %vm77_vm0, %v2227_v37 }
 0x7a2   :  { %v2701_v28 = vpop.f32.mrb[14].mxu0 }
 0x7a3   :  { %v2317_v6 = vadd.f32 %v2701_v28, %v2533_v4  ;;  %v2311_v7 = vpop.f32.mrb[15].mxu0 }
 0x7a4   :  { %v2312_v9 = vadd.f32 %v2533_v4, %v2311_v7 }
 0x7a5   :  { %v2321_v14 = vmax.f32 %v2317_v6, 0.0 }
 0x7a6   :  { %v2320_v11 = vmax.f32 %v2312_v9, 0.0 }
 0x7a8   :  { %2718 = vmatprep.mubr.msk.f32.mxu1 %vm2334_vm4, %v2320_v11 }
 0x7a9   :  { %2719 = vmatmul.mubr.msk.f32.vlgmr.msra.gmra.mrb[12].mxu1 %vm2334_vm4, %v2321_v14 }
 0x87c   :  { %v2720_v13 = vpop.f32.mrb[12].mxu1 }
 0x87d   :  { %v2413_v20 = vadd.f32 %v2720_v13, %v2333_v17  ;;  %v2407_v32 = vpop.f32.mrb[13].mxu1 }
 0x87e   :  { %v2408_v43 = vadd.f32 %v2407_v32, %v2333_v17 }
 0x87f   :  { %v2417_v34 = vadd.f32 %v2413_v20, %v2227_v37 }
 0x880   :  { %v2416_v23 = vadd.f32 %v2408_v43, %v2226_v0 }
 0x881   :  { %v2421_v25 = vsel %vm77_vm0, %v2417_v34, 0.0 }
 0x882   :  { %2422 = vadd.xlane.f32.xlu1 %v2421_v25  ;;  %v2418_v26 = vsel %vm77_vm0, %v2416_v23, 0.0 }
 0x883   :  { %2419 = vadd.xlane.f32.xlu0 %v2418_v26 }
 0x90f   :  { %v2423_v29 = vpop.xlane.xlu1 %2422 }
 0x910   :  { %v2425_v31 = vmul.f32 0.03125, %v2423_v29  ;;  %v2420_v36 = vpop.xlane.xlu0 %2419 }
 0x911   :  { %v2424_v10 = vmul.f32 0.03125, %v2420_v36 }
 0x912   :  { %v2427_v38 = vsub.f32 %v2417_v34, %v2425_v31 }
 0x913   :  { %v2426_v40 = vsub.f32 %v2416_v23, %v2424_v10 }
 0x914   :  { %v2429_v41 = vmul.f32 %v2427_v38, %v2427_v38 }
 0x915   :  { %v2428_v35 = vmul.f32 %v2426_v40, %v2426_v40 }
 0x916   :  { %v2433_v46 = vsel %vm77_vm0, %v2429_v41, 0.0 }
 0x917   :  { %2434 = vadd.xlane.f32.xlu1 %v2433_v46  ;;  %v2430_v47 = vsel %vm77_vm0, %v2428_v35, 0.0 }
 0x918   :  { %2431 = vadd.xlane.f32.xlu0 %v2430_v47 }
 0x9a4   :  { %v2435_v48 = vpop.xlane.xlu1 %2434 }
 0x9a5   :  { %v2437_v42 = vmul.f32 0.03125, %v2435_v48  ;;  %v2432_v21 = vpop.xlane.xlu0 %2431 }
 0x9a6   :  { %v2436_v49 = vmul.f32 0.03125, %v2432_v21 }
 0x9a7   :  { %v2439_v50 = vadd.f32 1e-06, %v2437_v42 }
 0x9a8   :  { %v2438_v12 = vadd.f32 1e-06, %v2436_v49 }
 0x9a9   :  { %2847 = vrsqrt.f32 %v2439_v50 }
 0x9aa   :  { %2849 = vrsqrt.f32 %v2438_v12 }
 0x9b3   :  { %v2848_v15 = vpop.eup %2847 }
 0x9b4   :  { %v2850_v19 = vpop.eup %2849  ;;  %v2443_v22 = vmul.f32 %v2848_v15, %v2427_v38 }
 0x9b5   :  { %v2442_v51 = vmul.f32 %v2850_v19, %v2426_v40 }
 0x9b6   :  { %v2449_v52 = vmul.f32 %v2447_v18, %v2443_v22 }
 0x9b7   :  { %v2448_v53 = vmul.f32 %v2447_v18, %v2442_v51 }
 0x9b8   :  { %v2455_v45 = vadd.f32 %v2453_v39, %v2449_v52 }
 0x9b9   :  { %v2454_v54 = vadd.f32 %v2453_v39, %v2448_v53 }
 0x9ba   :  { %2457 = vst.msk [vmem:[#allocation7 + $0x8] sm:$0xff] %vm77_vm0, %v2455_v45 }
 0x9bb   :  { %2456 = vst.msk [vmem:[#allocation7] sm:$0xff] %vm77_vm0, %v2454_v54 }
 0x9bc   :  { %2908 = shalt.err (!%p2905_p6)
}
 0x9bd   :  { %s2909_s23 = scalar_lea.hbm %s3419_s9, 256 }
 0x9be   :  { %p2910_p7 = scmp.ne.s32.totalorder %s3419_s9, %s2909_s23  ;;  %p2913_p8 = scmp.lt.u32.totalorder %s2909_s23, %s3419_s9 }
 0x9c0   :  { %p2915_p9 = pnand %p2913_p8, %p2910_p7 }
 0x9c2   :  { %2918 = shalt.err (!%p2915_p9)
}
 0x9c3   :  { %2469 = dma.vmem_to_hbm [thread:$0]  %s2464_s7, 256, %s3419_s9, [#allocation4], %s2926_s19, %s2926_s19, %s2927_s20  }
 0x9c4   :  { %2923 = dma.done.wait [#allocation4], 256  }
 0x9c5   :  { %2924 = vsyncadd [#allocation4], 4294967040 }
 0x9c6   :  { %2473 = vsyncpa [#allocation3], 1 }
 0x9c7   :  { %2474 = vsyncpa [#allocation6], 1 }
 0x9c8   :  { %2475 = vsyncpa [#allocation4], 1 }

</bundles_post_ra>
